<compile_context>
chip_gen: v6e
topology: v6e:2x2x1
jax: 0.10.0
libtpu: 0.0.40
codegen_flags: <defaults>
</compile_context>

<pallas_src>
import jax
import jax.numpy as jnp
from jax import lax
from jax.experimental import pallas as pl
from jax.experimental.pallas import tpu as pltpu


def two_layer_kernel(x_ref, w1_ref, w2_ref, o_ref):
    # x_ref: (TM, D_in), w1_ref: (H, D_in), w2_ref: (D_in, H), o_ref: (TM, D_in)
    x = x_ref[...]
    # h[b, j] = sum_d x[b, d] * w1[j, d]   (contract x axis 1 with w1 axis 1)
    h = lax.dot_general(
        x, w1_ref[...],
        dimension_numbers=(((1,), (1,)), ((), ())),
        preferred_element_type=jnp.float32,
    )
    # LeakyReLU, PyTorch default negative_slope = 0.01, kept in f32 on the accumulator.
    h = jnp.where(h > 0, h, jnp.float32(0.01) * h)
    # y[b, o] = sum_j h[b, j] * w2[o, j]   (contract h axis 1 with w2 axis 1)
    y = lax.dot_general(
        h, w2_ref[...],
        dimension_numbers=(((1,), (1,)), ((), ())),
        preferred_element_type=jnp.float32,
    )
    o_ref[...] = y.astype(o_ref.dtype)


def _pick_batch_tile(B, D_in, H, *, bytes_per_elem=4,
                     vmem_budget_bytes=8 * 1024 * 1024, max_tm=1024):
    """Batch tile sized for a conservative VMEM budget (safe on v5e/v6e/v7x)."""
    # Streaming x + out, double-buffered: 2 arrays * 2 buffers * TM * D_in elems.
    per_row_bytes = 2 * 2 * D_in * bytes_per_elem
    # Resident weights (counted twice to be conservative about buffering).
    w_bytes = 2 * 2 * D_in * H * bytes_per_elem
    avail = max(vmem_budget_bytes - w_bytes, 8 * per_row_bytes)
    tm = int(min(avail // per_row_bytes, B, max_tm))
    if tm >= B:
        return B                      # single full block (block == full array dim)
    return max(8, (tm // 8) * 8)      # sublane-aligned tile


def two_layer_net(x, w1, w2, *, tm=None):
    """x: (B, D_in) f32; w1: (H, 1, D_in) Conv1 weight; w2: (D_in, H, 1) Conv2 weight."""
    B, D_in = x.shape
    H = w1.shape[0]

    # Free reshapes only (no transpose -> no extra HBM pass over the weights).
    w1_2d = w1.reshape(H, D_in)       # (H, D_in)
    w2_2d = w2.reshape(D_in, H)       # (D_in, H)

    if tm is None:
        tm = _pick_batch_tile(B, D_in, H)
    tm = min(tm, B)

    grid = (pl.cdiv(B, tm),)

    return pl.pallas_call(
        two_layer_kernel,
        out_shape=jax.ShapeDtypeStruct((B, D_in), x.dtype),
        grid_spec=pltpu.PrefetchScalarGridSpec(
            num_scalar_prefetch=0,
            grid=grid,
            in_specs=[
                pl.BlockSpec((tm, D_in), lambda i: (i, 0)),   # x streams over batch
                pl.BlockSpec((H, D_in), lambda i: (0, 0)),    # w1 resident in VMEM
                pl.BlockSpec((D_in, H), lambda i: (0, 0)),    # w2 resident in VMEM
            ],
            out_specs=pl.BlockSpec((tm, D_in), lambda i: (i, 0)),
        ),
        compiler_params=pltpu.CompilerParams(
            dimension_semantics=("parallel",),                # megacore on v7x
        ),
    )(x, w1_2d, w2_2d)


def two_layer_net_ref(x, w1, w2):
    """Pure-JAX reference mirroring the PyTorch forward."""
    B, D_in = x.shape
    H = w1.shape[0]
    h = x @ w1.reshape(H, D_in).T
    h = jnp.where(h > 0, h, 0.01 * h)
    return h @ w2.reshape(D_in, H).T


def _run_case(key, B, D_in, H):
    kx, k1, k2 = jax.random.split(key, 3)
    x = jax.random.normal(kx, (B, D_in), dtype=jnp.float32)
    # Conv1d weight shapes: (out_ch, in_ch, kernel).
    w1 = jax.random.normal(k1, (H, 1, D_in), dtype=jnp.float32) * (1.0 / D_in) ** 0.5
    w2 = jax.random.normal(k2, (D_in, H, 1), dtype=jnp.float32) * (1.0 / H) ** 0.5

    y = jax.block_until_ready(two_layer_net(x, w1, w2))
    y_ref = two_layer_net_ref(x, w1, w2)

    assert y.shape == (B, D_in), y.shape
    err = float(jnp.max(jnp.abs(y - y_ref)))
    assert jnp.allclose(y, y_ref, atol=1e-4, rtol=1e-4), err


if __name__ == "__main__":
    key = jax.random.PRNGKey(0)
    k_a, k_b = jax.random.split(key)

    # Tiny module-default-ish shapes (single block, D_in == full last dim).
    _run_case(k_a, B=8, D_in=16, H=32)

    # Larger lane-dense case: grid over batch (2 steps), weights resident,
    # batch axis parallel across TensorCores, unmasked 128-lane stores.
    _run_case(k_b, B=2048, D_in=128, H=128)

    print("KERNEL_OK")
</pallas_src>

<mosaic_0001>
module attributes {stable_mosaic.version = 11 : i64} {
  func.func @two_layer_kernel(%arg0: i32, %arg1: memref<8x16xf32, #tpu.memory_space<vmem>>, %arg2: memref<32x16xf32, #tpu.memory_space<vmem>>, %arg3: memref<16x32xf32, #tpu.memory_space<vmem>>, %arg4: memref<8x16xf32, #tpu.memory_space<vmem>>) attributes {dimension_semantics = [#tpu.dimension_semantics<parallel>], iteration_bounds = array<i64: 1>, scalar_prefetch = 0 : i64, scratch_operands = 0 : i64, tpu.core_type = #tpu.core_type<tc>, window_params = [{transform_indices = @transform_0, window_bounds = array<i64: 8, 16>}, {pipeline_mode = #tpu.pipeline_mode<synchronous>, transform_indices = @transform_1, window_bounds = array<i64: 32, 16>}, {pipeline_mode = #tpu.pipeline_mode<synchronous>, transform_indices = @transform_2, window_bounds = array<i64: 16, 32>}, {transform_indices = @transform_3, window_bounds = array<i64: 8, 16>}]} {
    %c0 = arith.constant 0 : index
    %c0_0 = arith.constant 0 : index
    %0 = vector.load %arg1[%c0, %c0_0] : memref<8x16xf32, #tpu.memory_space<vmem>>, vector<8x16xf32>
    %c0_1 = arith.constant 0 : index
    %c0_2 = arith.constant 0 : index
    %1 = vector.load %arg2[%c0_1, %c0_2] : memref<32x16xf32, #tpu.memory_space<vmem>>, vector<32x16xf32>
    %cst = arith.constant dense<0.000000e+00> : vector<8x32xf32>
    %2 = tpu.matmul %0, %1, %cst {dimension_numbers = #tpu.dot_dimension_numbers<[1], [1], [0], [0], [0, 0, 1, 0], [], []>} : vector<8x16xf32>, vector<32x16xf32>, vector<8x32xf32> -> vector<8x32xf32>
    %cst_3 = arith.constant 0.000000e+00 : f32
    %3 = vector.broadcast %cst_3 : f32 to vector<8x32xf32>
    %4 = arith.cmpf ogt, %2, %3 : vector<8x32xf32>
    %cst_4 = arith.constant 0.00999999977 : f32
    %5 = vector.broadcast %cst_4 : f32 to vector<8x32xf32>
    %6 = arith.mulf %5, %2 : vector<8x32xf32>
    %7 = arith.select %4, %2, %6 : vector<8x32xi1>, vector<8x32xf32>
    %c0_5 = arith.constant 0 : index
    %c0_6 = arith.constant 0 : index
    %8 = vector.load %arg3[%c0_5, %c0_6] : memref<16x32xf32, #tpu.memory_space<vmem>>, vector<16x32xf32>
    %cst_7 = arith.constant dense<0.000000e+00> : vector<8x16xf32>
    %9 = tpu.matmul %7, %8, %cst_7 {dimension_numbers = #tpu.dot_dimension_numbers<[1], [1], [0], [0], [0, 0, 1, 0], [], []>} : vector<8x32xf32>, vector<16x32xf32>, vector<8x16xf32> -> vector<8x16xf32>
    %c0_8 = arith.constant 0 : index
    %c0_9 = arith.constant 0 : index
    %10 = vector.load %arg4[%c0_8, %c0_9] : memref<8x16xf32, #tpu.memory_space<vmem>>, vector<8x16xf32>
    tpu.vector_store %arg4[%c0_8, %c0_9], %9 {strides = array<i32>} : memref<8x16xf32, #tpu.memory_space<vmem>>, vector<8x16xf32>,
    return
  }
  func.func @transform_0(%arg0: i32) -> (i32, i32) {
    %c0_i32 = arith.constant 0 : i32
    %c0_i32_0 = arith.constant 0 : i32
    return %arg0, %c0_i32 : i32, i32
  }
  func.func @transform_1(%arg0: i32) -> (i32, i32) {
    %c0_i32 = arith.constant 0 : i32
    %c0_i32_0 = arith.constant 0 : i32
    %c0_i32_1 = arith.constant 0 : i32
    return %c0_i32, %c0_i32_0 : i32, i32
  }
  func.func @transform_2(%arg0: i32) -> (i32, i32) {
    %c0_i32 = arith.constant 0 : i32
    %c0_i32_0 = arith.constant 0 : i32
    %c0_i32_1 = arith.constant 0 : i32
    return %c0_i32, %c0_i32_0 : i32, i32
  }
  func.func @transform_3(%arg0: i32) -> (i32, i32) {
    %c0_i32 = arith.constant 0 : i32
    %c0_i32_0 = arith.constant 0 : i32
    return %arg0, %c0_i32 : i32, i32
  }
}

</mosaic_0001>

<bundles_post_ra>
// kernel: tpu_custom_call.1
= control target key start
LH: loop header
LB: loop body
LE: loop exit
PB: predicated region body
PF: predicated region fallthrough
CT: control target
= control target key end

     0   :  { %vm20_vm0 = vcmask 130048   ;;  %v265_v1 = vmov 0.0   ;;  %vm266_vm1 = vmmov 0   ;;  %vm111_vm2 = vcmask 261120   ;;  %s321_s0 = inlined_call_operand.vmem [shape: f32[8,16], index: 0, kind: input, shape index: {}]   ;;  %s322_s1 = inlined_call_operand.vmem [shape: f32[32,16], index: 1, kind: input, shape index: {}]   ;;  %s323_s2 = inlined_call_operand.vmem [shape: f32[16,32], index: 2, kind: input, shape index: {}]   ;;  %s324_s3 = inlined_call_operand.hbm [shape: f32[8,16], index: 3, kind: output, shape index: {}]  }
   0x1   :  { %v19_v0 = vld [vmem:[%s322_s1 + $0x18] sm:$0xff]  ;;  %222 = vmatprep.subr.mxu0 %v265_v1  ;;  %230 = vmatprep.mubr.msk.f32.mxu0 %vm266_vm1, %v265_v1  ;;  %v110_v2 = vld [vmem:[%s323_s2 + $0x8] sm:$0xff] }
   0x2   :  { %223 = vmatpush3.xpose.msk.msra.mxu0 %vm20_vm0, %v19_v0  ;;  %233 = vmatprep.subr.mxu1 %v265_v1 }
   0x3   :  { %8 = vsyncpa [#allocation3], 0  ;;  %224 = vmatprep.subr.mxu0 %v265_v1  ;;  %v18_v3 = vld [vmem:[%s322_s1 + $0x10] sm:$0xff]  ;;  %234 = vmatpush3.xpose.msk.msra.mxu1 %vm111_vm2, %v110_v2  ;;  %v17_v4 = vld [vmem:[%s322_s1 + $0x8] sm:$0xff] }
   0x4   :  { %235 = vmatprep.subr.mxu1 %v265_v1  ;;  %237 = vmatprep.mubr.msk.f32.mxu1 %vm266_vm1, %v265_v1  ;;  %v16_v5 = vld [vmem:[%s322_s1] sm:$0xff]  ;;  %s267_s1 = smov [#allocation2]  }
   0x5   :  { %v15_v6 = vld [vmem:[%s321_s0] sm:$0xff]  ;;  %s198_s26 = sshll.u32 %s267_s1, 4  ;;  %s199_s26 = int_to_ptr.vmem [resolvable:$true] %s198_s26 }
   0x6   :  { %225 = vmatpush3.xpose.msk.msra.mxu0 %vm20_vm0, %v18_v3  ;;  %v109_v7 = vld [vmem:[%s323_s2] sm:$0xff]  ;;  %s243_s0 = scalar_lea.vmem %s199_s26, 128  ;;  %p248_p1 = scmp.lt.s32.totalorder %s199_s26, %s199_s26 }
   0x7   :  { %226 = vmatprep.subr.mxu0 %v265_v1  ;;  %236 = vmatpush3.xpose.msk.msra.mxu1 %vm111_vm2, %v109_v7  ;;  %p244_p0 = scmp.ne.s32.totalorder %s199_s26, %s243_s0  ;;  %p249_p2 = scmp.lt.s32.totalorder %s243_s0, %s243_s0 }
   0x9   :  { %p250_p3 = por %p249_p2, %p248_p1 }
   0xa   :  { %227 = vmatpush3.xpose.msk.msra.mxu0 %vm20_vm0, %v17_v4 }
   0xb   :  { %228 = vmatprep.subr.mxu0 %v265_v1  ;;  %p251_p4 = pnand %p250_p3, %p244_p0 }
   0xe   :  { %229 = vmatpush3.xpose.msk.msra.mxu0 %vm20_vm0, %v16_v5 }
  0x11   :  { %231 = vmatmul.mubr.msk.f32.vlgmr.msra.gmra.mxu0 %vm20_vm0, %v15_v6 }
  0xd1   :  { %v102_v8 = vpop.f32.mrf.mxu0 }
  0xd2   :  { %vm106_vm3 = vcmp.gt.f32.partialorder %v102_v8, 0.0  ;;  %v107_v9 = vmul.f32 0.01, %v102_v8 }
  0xd3   :  { %v232_v10 = vpop.f32.mrf.mxu0 }
  0xd4   :  { %v108_v11 = vsel %vm106_vm3, %v102_v8, %v107_v9 }
  0xd5   :  { %238 = vmatmul.mubr.msk.f32.vlgmr.msra.gmra.mxu1 %vm111_vm2, %v108_v11 }
 0x195   :  { %v187_v12 = vpop.f32.mrf.mxu1 }
 0x196   :  { %191 = vst.msk [vmem:[#allocation2] sm:$0xff] %vm20_vm0, %v187_v12 }
 0x197   :  { %v239_v13 = vpop.f32.mrf.mxu1 }
 0x198   :  { %254 = shalt.err (!%p251_p4)
}
 0x199   :  { %201 = dma.vmem_to_hbm [thread:$0]  %s199_s26, 128, %s324_s3, [#allocation3]  }
 0x19a   :  { %263 = dma.done.wait [#allocation3], 128  }
 0x19b   :  { %264 = vsyncadd [#allocation3], 4294967168 }
 0x19c   :  { %205 = vsyncpa [#allocation3], 1 }

</bundles_post_ra>
